<compile_context>
chip_gen: v5e
topology: v5e:2x2
jax: 0.10.0
libtpu: 0.0.40
codegen_flags: <defaults>
</compile_context>

<pallas_src>
import math
import functools

import jax
import jax.numpy as jnp
from jax import lax
from jax.experimental import pallas as pl
from jax.experimental.pallas import tpu as pltpu


def _round_up(x, m):
    return ((x + m - 1) // m) * m


def _gelu_exact(v):
    # Matches torch.nn.GELU() default (approximate='none'): 0.5*x*(1+erf(x/sqrt(2)))
    return 0.5 * v * (1.0 + lax.erf(v * (1.0 / math.sqrt(2.0))))


def fuse_kernel(*refs, alpha, part_dims, matmul_dtype):
    n = len(part_dims)
    x_ref = refs[0]
    y_refs = refs[1:1 + n]
    w1_ref, b1_ref, w2_ref, b2_ref, w3_ref, b3_ref, o_ref = refs[1 + n:]

    # ---- layer 1: split-K over the (fused-away) concat of the 5 parts ----
    w1 = w1_ref[...].astype(matmul_dtype)            # (in_f, hid_pad), weights resident in VMEM
    h = b1_ref[...].astype(jnp.float32)              # (1, hid_pad), broadcasts over rows
    off = 0
    for y_ref, d in zip(y_refs, part_dims):
        h = h + jnp.dot(y_ref[...].astype(matmul_dtype),
                        w1[off:off + d, :],
                        preferred_element_type=jnp.float32)
        off += d
    h = _gelu_exact(h)

    # ---- layer 2 ----
    h = jnp.dot(h.astype(matmul_dtype), w2_ref[...].astype(matmul_dtype),
                preferred_element_type=jnp.float32) + b2_ref[...].astype(jnp.float32)
    h = _gelu_exact(h)

    # ---- layer 3 ----
    h = jnp.dot(h.astype(matmul_dtype), w3_ref[...].astype(matmul_dtype),
                preferred_element_type=jnp.float32) + b3_ref[...].astype(jnp.float32)
    h = _gelu_exact(h)

    # ---- residual fuse ----
    o_ref[...] = (x_ref[...].astype(jnp.float32) + alpha * h).astype(o_ref.dtype)


def fuse_module_v1_3(x, y_list, params, *, alpha=1.0, tm=256,
                     matmul_dtype=jnp.float32):
    """x: (B, T, out_features); y_list: list of 5 arrays (B, T, part_dim_i)."""
    assert isinstance(y_list, (list, tuple)) and len(y_list) == 5

    B, T, out_f = x.shape
    part_dims = tuple(int(y.shape[2]) for y in y_list)
    in_f = sum(part_dims)
    M = B * T

    w1, b1, w2, b2, w3, b3 = params
    hid = w1.shape[1]
    assert w1.shape[0] == in_f

    # ---- zero-pad hidden dim to a lane-aligned multiple of 128 (numerically exact) ----
    hid_p = _round_up(hid, 128)
    if hid_p != hid:
        w1 = jnp.pad(w1, ((0, 0), (0, hid_p - hid)))
        b1 = jnp.pad(b1, ((0, 0), (0, hid_p - hid)))
        w2 = jnp.pad(w2, ((0, hid_p - hid), (0, 0)))

    # ---- pick row tile; pad M so the grid divides exactly (no hard divisibility assert) ----
    tm_eff = min(int(tm), _round_up(M, 8))
    tm_eff = max(8, (tm_eff // 8) * 8)
    Mp = _round_up(M, tm_eff)

    xf = x.reshape(M, out_f)
    y_flat = [y.reshape(M, d) for y, d in zip(y_list, part_dims)]
    if Mp != M:
        xf = jnp.pad(xf, ((0, Mp - M), (0, 0)))
        y_flat = [jnp.pad(yf, ((0, Mp - M), (0, 0))) for yf in y_flat]

    grid = (Mp // tm_eff,)

    kernel = functools.partial(fuse_kernel, alpha=float(alpha),
                               part_dims=part_dims, matmul_dtype=matmul_dtype)

    in_specs = [pl.BlockSpec((tm_eff, out_f), lambda i: (i, 0))]          # x tile
    in_specs += [pl.BlockSpec((tm_eff, d), lambda i: (i, 0))              # 5 y-part tiles
                 for d in part_dims]
    in_specs += [
        pl.BlockSpec((in_f, hid_p), lambda i: (0, 0)),                    # W1 (resident)
        pl.BlockSpec((1, hid_p), lambda i: (0, 0)),                       # b1
        pl.BlockSpec((hid_p, out_f), lambda i: (0, 0)),                   # W2
        pl.BlockSpec((1, out_f), lambda i: (0, 0)),                       # b2
        pl.BlockSpec((out_f, out_f), lambda i: (0, 0)),                   # W3
        pl.BlockSpec((1, out_f), lambda i: (0, 0)),                       # b3
    ]

    out = pl.pallas_call(
        kernel,
        out_shape=jax.ShapeDtypeStruct((Mp, out_f), x.dtype),
        grid_spec=pltpu.PrefetchScalarGridSpec(
            num_scalar_prefetch=0,
            grid=grid,
            in_specs=in_specs,
            out_specs=pl.BlockSpec((tm_eff, out_f), lambda i: (i, 0)),
        ),
        compiler_params=pltpu.CompilerParams(
            dimension_semantics=("parallel",),
            vmem_limit_bytes=32 * 1024 * 1024,
        ),
    )(xf, *y_flat, w1, b1, w2, b2, w3, b3)

    if Mp != M:
        out = out[:M]
    return out.reshape(B, T, out_f)


def _init_params(key, in_f, out_f):
    """Deterministic synthetic weights matching nn.Linear shapes (stored transposed)."""
    hid = (in_f + out_f) // 2
    ks = jax.random.split(key, 6)

    def lin(kw, kb, fan_in, fan_out):
        bound = 1.0 / math.sqrt(fan_in)
        w = jax.random.uniform(kw, (fan_in, fan_out), jnp.float32, -bound, bound)
        b = jax.random.uniform(kb, (1, fan_out), jnp.float32, -bound, bound)
        return w, b

    w1, b1 = lin(ks[0], ks[1], in_f, hid)
    w2, b2 = lin(ks[2], ks[3], hid, out_f)
    w3, b3 = lin(ks[4], ks[5], out_f, out_f)
    return (w1, b1, w2, b2, w3, b3)


def _reference(x, y_list, params, alpha):
    # Pure-JAX reference of the PyTorch forward for validation.
    y = jnp.concatenate(list(y_list), axis=2)
    w1, b1, w2, b2, w3, b3 = params
    h = jax.nn.gelu(y @ w1 + b1[0], approximate=False)
    h = jax.nn.gelu(h @ w2 + b2[0], approximate=False)
    h = jax.nn.gelu(h @ w3 + b3[0], approximate=False)
    return x + alpha * h


if __name__ == "__main__":
    key = jax.random.PRNGKey(0)

    B, T = 2, 8                       # batch, nframes -> M = 16 rows
    out_features = 64
    part_dims = (32, 24, 40, 32, 32)  # 5 "other parts"; in_features = 160
    in_features = sum(part_dims)
    alpha = 1.0

    k_x, k_y, k_p = jax.random.split(key, 3)
    x = jax.random.normal(k_x, (B, T, out_features), jnp.float32)
    y_keys = jax.random.split(k_y, len(part_dims))
    y_list = [jax.random.normal(k, (B, T, d), jnp.float32)
              for k, d in zip(y_keys, part_dims)]

    params = _init_params(k_p, in_features, out_features)

    out = fuse_module_v1_3(x, y_list, params, alpha=alpha, tm=256)
    out = jax.block_until_ready(out)

    ref = _reference(x, y_list, params, alpha)
    assert out.shape == (B, T, out_features)
    assert jnp.allclose(out, ref, atol=1e-4, rtol=1e-4)

    print("KERNEL_OK")
</pallas_src>

<mosaic_0001>
module attributes {stable_mosaic.version = 11 : i64} {
  func.func @fuse_kernel(%arg0: i32, %arg1: memref<16x64xf32, #tpu.memory_space<vmem>>, %arg2: memref<16x32xf32, #tpu.memory_space<vmem>>, %arg3: memref<16x24xf32, #tpu.memory_space<vmem>>, %arg4: memref<16x40xf32, #tpu.memory_space<vmem>>, %arg5: memref<16x32xf32, #tpu.memory_space<vmem>>, %arg6: memref<16x32xf32, #tpu.memory_space<vmem>>, %arg7: memref<160x128xf32, #tpu.memory_space<vmem>>, %arg8: memref<1x128xf32, #tpu.memory_space<vmem>>, %arg9: memref<128x64xf32, #tpu.memory_space<vmem>>, %arg10: memref<1x64xf32, #tpu.memory_space<vmem>>, %arg11: memref<64x64xf32, #tpu.memory_space<vmem>>, %arg12: memref<1x64xf32, #tpu.memory_space<vmem>>, %arg13: memref<16x64xf32, #tpu.memory_space<vmem>>) attributes {dimension_semantics = [#tpu.dimension_semantics<parallel>], iteration_bounds = array<i64: 1>, scalar_prefetch = 0 : i64, scratch_operands = 0 : i64, tpu.core_type = #tpu.core_type<tc>, window_params = [{transform_indices = @transform_0, window_bounds = array<i64: 16, 64>}, {transform_indices = @transform_1, window_bounds = array<i64: 16, 32>}, {transform_indices = @transform_2, window_bounds = array<i64: 16, 24>}, {transform_indices = @transform_3, window_bounds = array<i64: 16, 40>}, {transform_indices = @transform_4, window_bounds = array<i64: 16, 32>}, {transform_indices = @transform_5, window_bounds = array<i64: 16, 32>}, {pipeline_mode = #tpu.pipeline_mode<synchronous>, transform_indices = @transform_6, window_bounds = array<i64: 160, 128>}, {pipeline_mode = #tpu.pipeline_mode<synchronous>, transform_indices = @transform_7, window_bounds = array<i64: 1, 128>}, {pipeline_mode = #tpu.pipeline_mode<synchronous>, transform_indices = @transform_8, window_bounds = array<i64: 128, 64>}, {pipeline_mode = #tpu.pipeline_mode<synchronous>, transform_indices = @transform_9, window_bounds = array<i64: 1, 64>}, {pipeline_mode = #tpu.pipeline_mode<synchronous>, transform_indices = @transform_10, window_bounds = array<i64: 64, 64>}, {pipeline_mode = #tpu.pipeline_mode<synchronous>, transform_indices = @transform_11, window_bounds = array<i64: 1, 64>}, {transform_indices = @transform_12, window_bounds = array<i64: 16, 64>}]} {
    %c0 = arith.constant 0 : index
    %c0_0 = arith.constant 0 : index
    %0 = vector.load %arg7[%c0, %c0_0] : memref<160x128xf32, #tpu.memory_space<vmem>>, vector<160x128xf32>
    %c0_1 = arith.constant 0 : index
    %c0_2 = arith.constant 0 : index
    %1 = vector.load %arg8[%c0_1, %c0_2] : memref<1x128xf32, #tpu.memory_space<vmem>>, vector<1x128xf32>
    %c0_3 = arith.constant 0 : index
    %c0_4 = arith.constant 0 : index
    %2 = vector.load %arg2[%c0_3, %c0_4] : memref<16x32xf32, #tpu.memory_space<vmem>>, vector<16x32xf32>
    %3 = vector.extract_strided_slice %0 {offsets = [0, 0], sizes = [32, 128], strides = [1, 1]} : vector<160x128xf32> to vector<32x128xf32>
    %cst = arith.constant dense<0.000000e+00> : vector<16x128xf32>
    %4 = tpu.matmul %2, %3, %cst {dimension_numbers = #tpu.dot_dimension_numbers<[1], [0], [0], [1], [0, 0, 1, 1], [], []>} : vector<16x32xf32>, vector<32x128xf32>, vector<16x128xf32> -> vector<16x128xf32>
    %5 = vector.broadcast %1 : vector<1x128xf32> to vector<16x128xf32>
    %6 = arith.addf %5, %4 : vector<16x128xf32>
    %c0_5 = arith.constant 0 : index
    %c0_6 = arith.constant 0 : index
    %7 = vector.load %arg3[%c0_5, %c0_6] : memref<16x24xf32, #tpu.memory_space<vmem>>, vector<16x24xf32>
    %8 = vector.extract_strided_slice %0 {offsets = [32, 0], sizes = [24, 128], strides = [1, 1]} : vector<160x128xf32> to vector<24x128xf32>
    %cst_7 = arith.constant dense<0.000000e+00> : vector<16x128xf32>
    %9 = tpu.matmul %7, %8, %cst_7 {dimension_numbers = #tpu.dot_dimension_numbers<[1], [0], [0], [1], [0, 0, 1, 1], [], []>} : vector<16x24xf32>, vector<24x128xf32>, vector<16x128xf32> -> vector<16x128xf32>
    %10 = arith.addf %6, %9 : vector<16x128xf32>
    %c0_8 = arith.constant 0 : index
    %c0_9 = arith.constant 0 : index
    %11 = vector.load %arg4[%c0_8, %c0_9] : memref<16x40xf32, #tpu.memory_space<vmem>>, vector<16x40xf32>
    %12 = vector.extract_strided_slice %0 {offsets = [56, 0], sizes = [40, 128], strides = [1, 1]} : vector<160x128xf32> to vector<40x128xf32>
    %cst_10 = arith.constant dense<0.000000e+00> : vector<16x128xf32>
    %13 = tpu.matmul %11, %12, %cst_10 {dimension_numbers = #tpu.dot_dimension_numbers<[1], [0], [0], [1], [0, 0, 1, 1], [], []>} : vector<16x40xf32>, vector<40x128xf32>, vector<16x128xf32> -> vector<16x128xf32>
    %14 = arith.addf %10, %13 : vector<16x128xf32>
    %c0_11 = arith.constant 0 : index
    %c0_12 = arith.constant 0 : index
    %15 = vector.load %arg5[%c0_11, %c0_12] : memref<16x32xf32, #tpu.memory_space<vmem>>, vector<16x32xf32>
    %16 = vector.extract_strided_slice %0 {offsets = [96, 0], sizes = [32, 128], strides = [1, 1]} : vector<160x128xf32> to vector<32x128xf32>
    %cst_13 = arith.constant dense<0.000000e+00> : vector<16x128xf32>
    %17 = tpu.matmul %15, %16, %cst_13 {dimension_numbers = #tpu.dot_dimension_numbers<[1], [0], [0], [1], [0, 0, 1, 1], [], []>} : vector<16x32xf32>, vector<32x128xf32>, vector<16x128xf32> -> vector<16x128xf32>
    %18 = arith.addf %14, %17 : vector<16x128xf32>
    %c0_14 = arith.constant 0 : index
    %c0_15 = arith.constant 0 : index
    %19 = vector.load %arg6[%c0_14, %c0_15] : memref<16x32xf32, #tpu.memory_space<vmem>>, vector<16x32xf32>
    %20 = vector.extract_strided_slice %0 {offsets = [128, 0], sizes = [32, 128], strides = [1, 1]} : vector<160x128xf32> to vector<32x128xf32>
    %cst_16 = arith.constant dense<0.000000e+00> : vector<16x128xf32>
    %21 = tpu.matmul %19, %20, %cst_16 {dimension_numbers = #tpu.dot_dimension_numbers<[1], [0], [0], [1], [0, 0, 1, 1], [], []>} : vector<16x32xf32>, vector<32x128xf32>, vector<16x128xf32> -> vector<16x128xf32>
    %22 = arith.addf %18, %21 : vector<16x128xf32>
    %cst_17 = arith.constant 5.000000e-01 : f32
    %23 = vector.broadcast %cst_17 : f32 to vector<16x128xf32>
    %24 = arith.mulf %23, %22 : vector<16x128xf32>
    %cst_18 = arith.constant 0.707106769 : f32
    %25 = vector.broadcast %cst_18 : f32 to vector<16x128xf32>
    %26 = arith.mulf %22, %25 : vector<16x128xf32>
    %27 = math.erf %26 : vector<16x128xf32>
    %cst_19 = arith.constant 1.000000e+00 : f32
    %28 = vector.broadcast %cst_19 : f32 to vector<16x128xf32>
    %29 = arith.addf %28, %27 : vector<16x128xf32>
    %30 = arith.mulf %24, %29 : vector<16x128xf32>
    %c0_20 = arith.constant 0 : index
    %c0_21 = arith.constant 0 : index
    %31 = vector.load %arg9[%c0_20, %c0_21] : memref<128x64xf32, #tpu.memory_space<vmem>>, vector<128x64xf32>
    %cst_22 = arith.constant dense<0.000000e+00> : vector<16x64xf32>
    %32 = tpu.matmul %30, %31, %cst_22 {dimension_numbers = #tpu.dot_dimension_numbers<[1], [0], [0], [1], [0, 0, 1, 1], [], []>} : vector<16x128xf32>, vector<128x64xf32>, vector<16x64xf32> -> vector<16x64xf32>
    %c0_23 = arith.constant 0 : index
    %c0_24 = arith.constant 0 : index
    %33 = vector.load %arg10[%c0_23, %c0_24] : memref<1x64xf32, #tpu.memory_space<vmem>>, vector<1x64xf32>
    %34 = vector.broadcast %33 : vector<1x64xf32> to vector<16x64xf32>
    %35 = arith.addf %32, %34 : vector<16x64xf32>
    %cst_25 = arith.constant 5.000000e-01 : f32
    %36 = vector.broadcast %cst_25 : f32 to vector<16x64xf32>
    %37 = arith.mulf %36, %35 : vector<16x64xf32>
    %cst_26 = arith.constant 0.707106769 : f32
    %38 = vector.broadcast %cst_26 : f32 to vector<16x64xf32>
    %39 = arith.mulf %35, %38 : vector<16x64xf32>
    %40 = math.erf %39 : vector<16x64xf32>
    %cst_27 = arith.constant 1.000000e+00 : f32
    %41 = vector.broadcast %cst_27 : f32 to vector<16x64xf32>
    %42 = arith.addf %41, %40 : vector<16x64xf32>
    %43 = arith.mulf %37, %42 : vector<16x64xf32>
    %c0_28 = arith.constant 0 : index
    %c0_29 = arith.constant 0 : index
    %44 = vector.load %arg11[%c0_28, %c0_29] : memref<64x64xf32, #tpu.memory_space<vmem>>, vector<64x64xf32>
    %cst_30 = arith.constant dense<0.000000e+00> : vector<16x64xf32>
    %45 = tpu.matmul %43, %44, %cst_30 {dimension_numbers = #tpu.dot_dimension_numbers<[1], [0], [0], [1], [0, 0, 1, 1], [], []>} : vector<16x64xf32>, vector<64x64xf32>, vector<16x64xf32> -> vector<16x64xf32>
    %c0_31 = arith.constant 0 : index
    %c0_32 = arith.constant 0 : index
    %46 = vector.load %arg12[%c0_31, %c0_32] : memref<1x64xf32, #tpu.memory_space<vmem>>, vector<1x64xf32>
    %47 = vector.broadcast %46 : vector<1x64xf32> to vector<16x64xf32>
    %48 = arith.addf %45, %47 : vector<16x64xf32>
    %cst_33 = arith.constant 5.000000e-01 : f32
    %49 = vector.broadcast %cst_33 : f32 to vector<16x64xf32>
    %50 = arith.mulf %49, %48 : vector<16x64xf32>
    %cst_34 = arith.constant 0.707106769 : f32
    %51 = vector.broadcast %cst_34 : f32 to vector<16x64xf32>
    %52 = arith.mulf %48, %51 : vector<16x64xf32>
    %53 = math.erf %52 : vector<16x64xf32>
    %cst_35 = arith.constant 1.000000e+00 : f32
    %54 = vector.broadcast %cst_35 : f32 to vector<16x64xf32>
    %55 = arith.addf %54, %53 : vector<16x64xf32>
    %56 = arith.mulf %50, %55 : vector<16x64xf32>
    %c0_36 = arith.constant 0 : index
    %c0_37 = arith.constant 0 : index
    %57 = vector.load %arg1[%c0_36, %c0_37] : memref<16x64xf32, #tpu.memory_space<vmem>>, vector<16x64xf32>
    %cst_38 = arith.constant 1.000000e+00 : f32
    %58 = vector.broadcast %cst_38 : f32 to vector<16x64xf32>
    %59 = arith.mulf %58, %56 : vector<16x64xf32>
    %60 = arith.addf %57, %59 : vector<16x64xf32>
    %c0_39 = arith.constant 0 : index
    %c0_40 = arith.constant 0 : index
    %61 = vector.load %arg13[%c0_39, %c0_40] : memref<16x64xf32, #tpu.memory_space<vmem>>, vector<16x64xf32>
    tpu.vector_store %arg13[%c0_39, %c0_40], %60 {strides = array<i32>} : memref<16x64xf32, #tpu.memory_space<vmem>>, vector<16x64xf32>,
    return
  }
  func.func @transform_0(%arg0: i32) -> (i32, i32) {
    %c0_i32 = arith.constant 0 : i32
    %c0_i32_0 = arith.constant 0 : i32
    return %arg0, %c0_i32 : i32, i32
  }
  func.func @transform_1(%arg0: i32) -> (i32, i32) {
    %c0_i32 = arith.constant 0 : i32
    %c0_i32_0 = arith.constant 0 : i32
    return %arg0, %c0_i32 : i32, i32
  }
  func.func @transform_2(%arg0: i32) -> (i32, i32) {
    %c0_i32 = arith.constant 0 : i32
    %c0_i32_0 = arith.constant 0 : i32
    return %arg0, %c0_i32 : i32, i32
  }
  func.func @transform_3(%arg0: i32) -> (i32, i32) {
    %c0_i32 = arith.constant 0 : i32
    %c0_i32_0 = arith.constant 0 : i32
    return %arg0, %c0_i32 : i32, i32
  }
  func.func @transform_4(%arg0: i32) -> (i32, i32) {
    %c0_i32 = arith.constant 0 : i32
    %c0_i32_0 = arith.constant 0 : i32
    return %arg0, %c0_i32 : i32, i32
  }
  func.func @transform_5(%arg0: i32) -> (i32, i32) {
    %c0_i32 = arith.constant 0 : i32
    %c0_i32_0 = arith.constant 0 : i32
    return %arg0, %c0_i32 : i32, i32
  }
  func.func @transform_6(%arg0: i32) -> (i32, i32) {
    %c0_i32 = arith.constant 0 : i32
    %c0_i32_0 = arith.constant 0 : i32
    %c0_i32_1 = arith.constant 0 : i32
    return %c0_i32, %c0_i32_0 : i32, i32
  }
  func.func @transform_7(%arg0: i32) -> (i32, i32) {
    %c0_i32 = arith.constant 0 : i32
    %c0_i32_0 = arith.constant 0 : i32
    %c0_i32_1 = arith.constant 0 : i32
    return %c0_i32, %c0_i32_0 : i32, i32
  }
  func.func @transform_8(%arg0: i32) -> (i32, i32) {
    %c0_i32 = arith.constant 0 : i32
    %c0_i32_0 = arith.constant 0 : i32
    %c0_i32_1 = arith.constant 0 : i32
    return %c0_i32, %c0_i32_0 : i32, i32
  }
  func.func @transform_9(%arg0: i32) -> (i32, i32) {
    %c0_i32 = arith.constant 0 : i32
    %c0_i32_0 = arith.constant 0 : i32
    %c0_i32_1 = arith.constant 0 : i32
    return %c0_i32, %c0_i32_0 : i32, i32
  }
  func.func @transform_10(%arg0: i32) -> (i32, i32) {
    %c0_i32 = arith.constant 0 : i32
    %c0_i32_0 = arith.constant 0 : i32
    %c0_i32_1 = arith.constant 0 : i32
    return %c0_i32, %c0_i32_0 : i32, i32
  }
  func.func @transform_11(%arg0: i32) -> (i32, i32) {
    %c0_i32 = arith.constant 0 : i32
    %c0_i32_0 = arith.constant 0 : i32
    %c0_i32_1 = arith.constant 0 : i32
    return %c0_i32, %c0_i32_0 : i32, i32
  }
  func.func @transform_12(%arg0: i32) -> (i32, i32) {
    %c0_i32 = arith.constant 0 : i32
    %c0_i32_0 = arith.constant 0 : i32
    return %arg0, %c0_i32 : i32, i32
  }
}

</mosaic_0001>

<bundles_post_ra>
// kernel: tpu_custom_call.1
= control target key start
LH: loop header
LB: loop body
LE: loop exit
PB: predicated region body
PF: predicated region fallthrough
CT: control target
= control target key end

     0   :  { %17 = vsyncpa [#allocation3], 0  ;;  %s1180_s0 = inlined_call_operand.vmem [shape: f32[16,64], index: 0, kind: input, shape index: {}]   ;;  %s1181_s1 = inlined_call_operand.vmem [shape: f32[16,32], index: 1, kind: input, shape index: {}]   ;;  %s1182_s2 = inlined_call_operand.hbm [shape: f32[16,24], index: 2, kind: input, shape index: {}]   ;;  %s1183_s3 = inlined_call_operand.hbm [shape: f32[16,40], index: 3, kind: input, shape index: {}]   ;;  %s1184_s4 = inlined_call_operand.hbm [shape: f32[16,32], index: 4, kind: input, shape index: {}]   ;;  %s1185_s5 = inlined_call_operand.hbm [shape: f32[16,32], index: 5, kind: input, shape index: {}]   ;;  %s1186_s6 = inlined_call_operand.vmem [shape: f32[160,128], index: 6, kind: input, shape index: {}]   ;;  %s1187_s7 = inlined_call_operand.vmem [shape: f32[1,128], index: 7, kind: input, shape index: {}]   ;;  %s1188_s8 = inlined_call_operand.vmem [shape: f32[128,64], index: 8, kind: input, shape index: {}]   ;;  %s1189_s9 = inlined_call_operand.vmem [shape: f32[1,64], index: 9, kind: input, shape index: {}]   ;;  %s1190_s10 = inlined_call_operand.hbm [shape: f32[64,64], index: 10, kind: input, shape index: {}]   ;;  %s1191_s11 = inlined_call_operand.vmem [shape: f32[1,64], index: 11, kind: input, shape index: {}]   ;;  %s1192_s12 = inlined_call_operand.hbm [shape: f32[16,64], index: 12, kind: output, shape index: {}]  }
   0x1   :  { %18 = vsyncpa [#allocation6], 0 }
   0x2   :  { %19 = vsyncpa [#allocation9], 0 }
   0x3   :  { %20 = vsyncpa [#allocation4], 0  ;;  %s42_s23 = sshll.u32 %s1183_s3, 4  ;;  %s881_s24 = smov [#allocation5]   ;;  %s43_s23 = int_to_ptr.hbm [resolvable:$true] %s42_s23 }
   0x4   :  { %s44_s25 = sshll.u32 %s881_s24, 4  ;;  %s68_s28 = sshll.u32 %s1185_s5, 4  ;;  %s45_s25 = int_to_ptr.vmem [resolvable:$true] %s44_s25  ;;  %s69_s28 = int_to_ptr.hbm [resolvable:$true] %s68_s28 }
   0x5   :  { %s882_s29 = smov 128   ;;  %s883_s30 = smov 8  }
   0x6   :  { %50 = dma.hbm_to_vmem [thread:$0]  %s43_s23, 256, %s45_s25, [#allocation6], %s882_s29, %s882_s29, %s883_s30  }
   0x7   :  { %s884_s13 = smov [#allocation8]   ;;  %s29_s3 = sshll.u32 %s1182_s2, 4  ;;  %s30_s3 = int_to_ptr.hbm [resolvable:$true] %s29_s3 }
   0x8   :  { %s70_s14 = sshll.u32 %s884_s13, 4  ;;  %s55_s18 = sshll.u32 %s1184_s4, 4  ;;  %s71_s14 = int_to_ptr.vmem [resolvable:$true] %s70_s14  ;;  %s56_s18 = int_to_ptr.hbm [resolvable:$true] %s55_s18 }
   0x9   :  { %76 = dma.hbm_to_vmem [thread:$0]  %s69_s28, 256, %s71_s14, [#allocation9], %s882_s29, %s882_s29, %s883_s30  }
   0xa   :  { %s885_s19 = smov [#allocation2]   ;;  %s886_s21 = smov [#allocation7]  }
   0xb   :  { %s31_s20 = sshll.u32 %s885_s19, 4  ;;  %s57_s2 = sshll.u32 %s886_s21, 4  ;;  %s32_s20 = int_to_ptr.vmem [resolvable:$true] %s31_s20  ;;  %s58_s2 = int_to_ptr.vmem [resolvable:$true] %s57_s2 }
   0xc   :  { %37 = dma.hbm_to_vmem [thread:$0]  %s30_s3, 256, %s32_s20, [#allocation3], %s882_s29, %s882_s29, %s883_s30  }
   0xd   :  { %s89_s24 = sshll.u32 %s1190_s10, 4  ;;  %s887_s4 = smov [#allocation10]   ;;  %s90_s24 = int_to_ptr.hbm [resolvable:$true] %s89_s24 }
   0xe   :  { %63 = dma.hbm_to_vmem [thread:$0]  %s56_s18, 256, %s58_s2, [#allocation6], %s882_s29, %s882_s29, %s883_s30  }
   0xf   :  { %s91_s25 = sshll.u32 %s887_s4, 4  ;;  %s92_s25 = int_to_ptr.vmem [resolvable:$true] %s91_s25 }
  0x10   :  { %97 = dma.hbm_to_vmem [thread:$0]  %s90_s24, 1024, %s92_s25, [#allocation9], %s882_s29, %s882_s29, %s883_s30  }
  0x11   :  { %873 = dma.done.wait [#allocation3], 256  }
  0x12   :  { %874 = vsyncadd [#allocation3], 4294967040 }
  0x13   :  { %875 = dma.done.wait [#allocation6], 512  }
  0x14   :  { %876 = vsyncadd [#allocation6], 4294966784 }
  0x15   :  { %877 = dma.done.wait [#allocation9], 1280  }
  0x16   :  { %878 = vsyncadd [#allocation9], 4294966016  ;;  %v123_v0 = vld [vmem:[%s1186_s6 + $0x18] sm:$0xff]  ;;  %v122_v1 = vld [vmem:[%s1186_s6 + $0x10] sm:$0xff]  ;;  %vm143_vm0 = vcmask 261120   ;;  %vm180_vm1 = vcmask 195584  }
  0x17   :  { %162 = vmatpush.msra.mxu2 %v123_v0  ;;  %v121_v2 = vld [vmem:[%s1186_s6 + $0x8] sm:$0xff]  ;;  %v126_v3 = vld [vmem:[%s1186_s6 + $0x30] sm:$0xff]  ;;  %v120_v5 = vld [vmem:[%s1186_s6] sm:$0xff]  ;;  %vm214_vm2 = vcmask 326656   ;;  %s888_s21 = smov [#allocation11]   ;;  %s673_s24 = sshll.u32 %s1192_s12, 4  ;;  %s674_s24 = int_to_ptr.hbm [resolvable:$true] %s673_s24 }
  0x18   :  { %v125_v4 = vld [vmem:[%s1186_s6 + $0x28] sm:$0xff]  ;;  %200 = vmatpush.msra.mxu1 %v126_v3  ;;  %v124_v6 = vld [vmem:[%s1186_s6 + $0x20] sm:$0xff]  ;;  %v135_v9 = vld [vmem:[%s1186_s6 + $0x78] sm:$0xff]  ;;  %s671_s2 = sshll.u32 %s888_s21, 4  ;;  %s672_s2 = int_to_ptr.vmem [resolvable:$true] %s671_s2 }
  0x19   :  { %163 = vmatpush.msra.mxu2 %v122_v1  ;;  %v141_v7 = vld [vmem:[%s1181_s1] sm:$0xff]  ;;  %v131_v10 = vld [vmem:[%s1186_s6 + $0x58] sm:$0xff]  ;;  %266 = vmatpush.msra.mxu3 %v135_v9  ;;  %v134_v12 = vld [vmem:[%s1186_s6 + $0x70] sm:$0xff] }
  0x1a   :  { %201 = vmatpush.msra.mxu1 %v125_v4  ;;  %v178_v8 = vld [vmem:[#allocation2] sm:$0xff]  ;;  %v139_v11 = vld [vmem:[%s1186_s6 + $0x98] sm:$0xff]  ;;  %v130_v13 = vld [vmem:[%s1186_s6 + $0x50] sm:$0xff] }
  0x1b   :  { %164 = vmatpush.msra.mxu2 %v121_v2  ;;  %v138_v14 = vld [vmem:[%s1186_s6 + $0x90] sm:$0xff]  ;;  %v129_v15 = vld [vmem:[%s1186_s6 + $0x48] sm:$0xff]  ;;  %267 = vmatpush.msra.mxu3 %v134_v12  ;;  %v132_v18 = vld [vmem:[%s1186_s6 + $0x60] sm:$0xff] }
  0x1c   :  { %202 = vmatpush.msra.mxu1 %v124_v6  ;;  %v133_v16 = vld [vmem:[%s1186_s6 + $0x68] sm:$0xff]  ;;  %v128_v19 = vld [vmem:[%s1186_s6 + $0x40] sm:$0xff]  ;;  %v127_v23 = vld [vmem:[%s1186_s6 + $0x38] sm:$0xff] }
  0x1d   :  { %165 = vmatpush.msra.mxu2 %v120_v5  ;;  %690 = vmatmul.msk.f32.vlgmr.msra.gmra.mxu1 %vm180_vm1, %v178_v8  ;;  %v137_v17 = vld [vmem:[%s1186_s6 + $0x88] sm:$0xff]  ;;  %v246_v20 = vld [vmem:[#allocation7] sm:$0xff]  ;;  %v212_v26 = vld [vmem:[#allocation5] sm:$0xff] }
  0x1e   :  { %688 = vmatmul.msk.f32.vlgmr.msra.gmra.mxu2 %vm143_vm0, %v141_v7  ;;  %299 = vmatpush.msrb.mxu1 %v139_v11  ;;  %v142_v21 = vld [vmem:[%s1181_s1 + $0x8] sm:$0xff]  ;;  %v136_v24 = vld [vmem:[%s1186_s6 + $0x80] sm:$0xff]  ;;  %v279_v27 = vld [vmem:[#allocation8] sm:$0xff] }
  0x1f   :  { %232 = vmatpush.msrb.mxu2 %v131_v10  ;;  %268 = vmatpush.msra.mxu3 %v133_v16  ;;  %v179_v22 = vld [vmem:[#allocation2 + $0x8] sm:$0xff]  ;;  %v213_v28 = vld [vmem:[#allocation5 + $0x8] sm:$0xff]  ;;  %v714_v32 = vld [vmem:[%s1187_s7] ss:$0 sm:$0xff] }
  0x20   :  { %300 = vmatpush.msrb.mxu1 %v138_v14  ;;  %v247_v25 = vld [vmem:[#allocation7 + $0x8] sm:$0xff]  ;;  %v280_v29 = vld [vmem:[#allocation8 + $0x8] sm:$0xff]  ;;  %v414_v37 = vld [vmem:[%s1188_s8 + $0x70] sm:$0xff] }
  0x21   :  { %233 = vmatpush.msrb.mxu2 %v130_v13  ;;  %269 = vmatpush.msra.mxu3 %v132_v18  ;;  %v415_v35 = vld [vmem:[%s1188_s8 + $0x78] sm:$0xff]  ;;  %v413_v39 = vld [vmem:[%s1188_s8 + $0x68] sm:$0xff]  ;;  %v412_v43 = vld [vmem:[%s1188_s8 + $0x60] sm:$0xff] }
  0x22   :  { %301 = vmatpush.msrb.mxu1 %v137_v17  ;;  %694 = vmatmul.msk.f32.vlgmr.msra.gmra.mxu3 %vm143_vm0, %v246_v20  ;;  %v411_v45 = vld [vmem:[%s1188_s8 + $0x58] sm:$0xff]  ;;  %v410_v48 = vld [vmem:[%s1188_s8 + $0x50] sm:$0xff]  ;;  %v409_v50 = vld [vmem:[%s1188_s8 + $0x48] sm:$0xff] }
  0x23   :  { %234 = vmatpush.msrb.mxu2 %v129_v15  ;;  %420 = vmatpush.msra.mxu0 %v415_v35  ;;  %v408_v55 = vld [vmem:[%s1188_s8 + $0x40] sm:$0xff]  ;;  %v407_v58 = vld [vmem:[%s1188_s8 + $0x38] sm:$0xff]  ;;  %v406_v60 = vld [vmem:[%s1188_s8 + $0x30] sm:$0xff] }
  0x24   :  { %302 = vmatpush.msrb.mxu1 %v136_v24  ;;  %v405_v63 = vld [vmem:[%s1188_s8 + $0x28] sm:$0xff]  ;;  %v404_v3 = vld [vmem:[%s1188_s8 + $0x20] sm:$0xff]  ;;  %v403_v6 = vld [vmem:[%s1188_s8 + $0x18] sm:$0xff] }
  0x25   :  { %235 = vmatpush.msrb.mxu2 %v128_v19  ;;  %691 = vmatmul.msk.f32.gmra.mxu1 %vm180_vm1, %v179_v22  ;;  %v402_v10 = vld [vmem:[%s1188_s8 + $0x10] sm:$0xff]  ;;  %v401_v13 = vld [vmem:[%s1188_s8 + $0x8] sm:$0xff]  ;;  %v400_v18 = vld [vmem:[%s1188_s8] sm:$0xff]  ;;  %vm543_vm1 = vcmask 523264  }
  0x26   :  { %689 = vmatmul.msk.f32.gmra.mxu2 %vm143_vm0, %v142_v21  ;;  %421 = vmatpush.msra.mxu0 %v414_v37 }
  0x27   :  { %236 = vmatpush.msrb.mxu2 %v127_v23 }
  0x28   :  { %422 = vmatpush.msra.mxu0 %v413_v39 }
  0x2a   :  { %695 = vmatmul.msk.f32.gmra.mxu3 %vm143_vm0, %v247_v25  ;;  %423 = vmatpush.msra.mxu0 %v412_v43 }
  0x2c   :  { %424 = vmatpush.msra.mxu0 %v411_v45 }
  0x2d   :  { %696 = vmatmul.msk.f32.vlgmr.msrb.gmra.mxu1 %vm143_vm0, %v279_v27 }
  0x2e   :  { %692 = vmatmul.msk.f32.vlgmr.msrb.gmra.mxu2 %vm214_vm2, %v212_v26  ;;  %425 = vmatpush.msra.mxu0 %v410_v48 }
  0x30   :  { %426 = vmatpush.msra.mxu0 %v409_v50 }
  0x32   :  { %427 = vmatpush.msra.mxu0 %v408_v55 }
  0x34   :  { %428 = vmatpush.msra.mxu0 %v407_v58 }
  0x35   :  { %697 = vmatmul.msk.f32.gmra.mxu1 %vm143_vm0, %v280_v29 }
  0x36   :  { %693 = vmatmul.msk.f32.gmra.mxu2 %vm214_vm2, %v213_v28  ;;  %429 = vmatpush.msra.mxu0 %v406_v60 }
  0x38   :  { %430 = vmatpush.msra.mxu0 %v405_v63 }
  0x3a   :  { %431 = vmatpush.msra.mxu0 %v404_v3 }
  0x3c   :  { %432 = vmatpush.msra.mxu0 %v403_v6 }
  0x3e   :  { %433 = vmatpush.msra.mxu0 %v402_v10 }
  0x40   :  { %434 = vmatpush.msra.mxu0 %v401_v13 }
  0x42   :  { %435 = vmatpush.msra.mxu0 %v400_v18 }
  0x9a   :  { %v204_v30 = vpop.f32.mrf.mxu1 }
  0xa1   :  { %v167_v31 = vpop.f32.mrf.mxu2 }
  0xa2   :  { %v207_v34 = vpop.f32.mrf.mxu1  ;;  %v176_v36 = vadd.f32 %v714_v32, %v167_v31 }
  0xa4   :  { %v210_v40 = vadd.f32 %v204_v30, %v176_v36 }
  0xa5   :  { %v271_v38 = vpop.f32.mrf.mxu3 }
  0xa9   :  { %v170_v33 = vpop.f32.mrf.mxu2 }
  0xaa   :  { %v304_v42 = vpop.f32.mrf.mxu1  ;;  %v177_v46 = vadd.f32 %v714_v32, %v170_v33 }
  0xac   :  { %v211_v51 = vadd.f32 %v207_v34, %v177_v46 }
  0xad   :  { %v274_v54 = vpop.f32.mrf.mxu3 }
  0xb1   :  { %v238_v41 = vpop.f32.mrf.mxu2 }
  0xb2   :  { %v244_v44 = vadd.f32 %v238_v41, %v210_v40  ;;  %v307_v59 = vpop.f32.mrf.mxu1 }
  0xb4   :  { %v277_v47 = vadd.f32 %v271_v38, %v244_v44 }
  0xb6   :  { %v1079_v49 = vadd.f32 %v304_v42, %v277_v47 }
  0xb8   :  { %v1085_v52 = vmul.f32 0.70710677, %v1079_v49 }
  0xb9   :  { %v241_v53 = vpop.f32.mrf.mxu2 }
  0xba   :  { %v316_v56 = vmul.f32 %v1085_v52, %v1085_v52  ;;  %v245_v57 = vadd.f32 %v241_v53, %v211_v51 }
  0xbc   :  { %v317_v61 = vmin.f32 %v316_v56, 16.0  ;;  %v278_v62 = vadd.f32 %v274_v54, %v245_v57 }
  0xbe   :  { %v318_v0 = vmul.f32 2.1237322e-06, %v317_v61  ;;  %v1101_v1 = vadd.f32 %v307_v59, %v278_v62  ;;  %v329_v2 = vmul.f32 3.8918573e-05, %v317_v61 }
  0xc0   :  { %v319_v4 = vadd.f32 0.00028619796, %v318_v0  ;;  %v1107_v5 = vmul.f32 0.70710677, %v1101_v1  ;;  %v330_v7 = vadd.f32 0.001143296, %v329_v2 }
  0xc2   :  { %v320_v8 = vmul.f32 %v319_v4, %v317_v61  ;;  %v356_v9 = vmul.f32 %v1107_v5, %v1107_v5  ;;  %v331_v11 = vmul.f32 %v330_v7, %v317_v61 }
  0xc4   :  { %v357_v12 = vmin.f32 %v356_v9, 16.0  ;;  %v332_v14 = vadd.f32 0.014752088, %v331_v11  ;;  %v321_v15 = vadd.f32 0.0036580483, %v320_v8  ;;  %v312_v9 = vmul.f32 0.5, %v1079_v49 }
  0xc5   :  { %v715_v49 = vld [vmem:[%s1189_s9] ss:$0 sm:$0xff] }
  0xc6   :  { %v358_v16 = vmul.f32 2.1237322e-06, %v357_v12  ;;  %v369_v17 = vmul.f32 3.8918573e-05, %v357_v12  ;;  %v333_v19 = vmul.f32 %v332_v14, %v317_v61  ;;  %v322_v23 = vmul.f32 %v321_v15, %v317_v61 }
  0xc8   :  { %v359_v20 = vadd.f32 0.00028619796, %v358_v16  ;;  %v370_v21 = vadd.f32 0.001143296, %v369_v17  ;;  %v334_v22 = vadd.f32 0.112945676, %v333_v19 }
  0xc9   :  { %v323_v30 = vadd.f32 0.05243302, %v322_v23  ;;  %v313_v17 = vmul.f32 0.5, %v1101_v1 }
  0xca   :  { %v360_v24 = vmul.f32 %v359_v20, %v357_v12  ;;  %v371_v25 = vmul.f32 %v370_v21, %v357_v12  ;;  %v335_v26 = vmul.f32 %v334_v22, %v317_v61 }
  0xcb   :  { %v324_v36 = vmul.f32 %v323_v30, %v317_v61 }
  0xcc   :  { %v372_v27 = vadd.f32 0.014752088, %v371_v25  ;;  %v361_v28 = vadd.f32 0.0036580483, %v360_v24  ;;  %v336_v29 = vadd.f32 0.4994258, %v335_v26 }
  0xcd   :  { %v325_v40 = vadd.f32 0.18741608, %v324_v36  ;;  %v538_v25 = vld [vmem:[#allocation10 + $0x38] sm:$0xff]  ;;  %v535_v36 = vld [vmem:[#allocation10 + $0x20] sm:$0xff] }
  0xce   :  { %v373_v31 = vmul.f32 %v372_v27, %v357_v12  ;;  %v337_v32 = vmul.f32 %v336_v29, %v317_v61  ;;  %v362_v34 = vmul.f32 %v361_v28, %v357_v12  ;;  %558 = vmatpush.msrb.mxu3 %v538_v25  ;;  %v537_v28 = vld [vmem:[#allocation10 + $0x30] sm:$0xff] }
  0xcf   :  { %v326_v45 = vmul.f32 %v325_v40, %v317_v61  ;;  %v534_v40 = vld [vmem:[#allocation10 + $0x18] sm:$0xff] }
  0xd0   :  { %v374_v33 = vadd.f32 0.112945676, %v373_v31  ;;  %v338_v35 = vadd.f32 1.0, %v337_v32  ;;  %v363_v39 = vadd.f32 0.05243302, %v362_v34  ;;  %559 = vmatpush.msrb.mxu3 %v537_v28  ;;  %v536_v32 = vld [vmem:[#allocation10 + $0x28] sm:$0xff] }
  0xd1   :  { %v327_v51 = vadd.f32 1.1283791, %v326_v45 }
  0xd2   :  { %v375_v37 = vmul.f32 %v374_v33, %v357_v12  ;;  %717 = vrcp.f32 %v338_v35  ;;  %v364_v44 = vmul.f32 %v363_v39, %v357_v12  ;;  %v350_v50 = vand.u32 2147483648, %v338_v35  ;;  %560 = vmatpush.msrb.mxu3 %v536_v32 }
  0xd3   :  { %v348_v54 = vand.u32 2147483647, %v338_v35  ;;  %vm344_vm4 = vweird.f32 %v338_v35  ;;  %v328_v60 = vmul.f32 %v327_v51, %v1085_v52 }
  0xd4   :  { %v376_v38 = vadd.f32 0.4994258, %v375_v37  ;;  %v365_v48 = vadd.f32 0.18741608, %v364_v44  ;;  %v351_v58 = vor.u32 1.1754944e-38, %v350_v50  ;;  %561 = vmatpush.msrb.mxu3 %v535_v36  ;;  %v533_v44 = vld [vmem:[#allocation10 + $0x10] sm:$0xff] }
  0xd5   :  { %vm349_vm6 = vcmp.eq.f32.partialorder %v348_v54, 8.507059e+37  ;;  %v532_v50 = vld [vmem:[#allocation10 + $0x8] sm:$0xff] }
  0xd6   :  { %v377_v41 = vmul.f32 %v376_v38, %v357_v12  ;;  %v366_v57 = vmul.f32 %v365_v48, %v357_v12  ;;  %562 = vmatpush.msrb.mxu3 %v534_v40 }
  0xd8   :  { %v378_v42 = vadd.f32 1.0, %v377_v41  ;;  %v718_v43 = vpop.eup %717  ;;  %v367_v3 = vadd.f32 1.1283791, %v366_v57  ;;  %563 = vmatpush.msrb.mxu3 %v533_v44 }
  0xd9   :  { %v340_v46 = vmul.f32 %v718_v43, %v338_v35  ;;  %vm345_vm3 = vweird.f32 %v718_v43 }
  0xda   :  { %719 = vrcp.f32 %v378_v42  ;;  %vm346_vm5 = vmor %vm344_vm4, %vm345_vm3  ;;  %v390_v2 = vand.u32 2147483648, %v378_v42  ;;  %v388_v6 = vand.u32 2147483647, %v378_v42  ;;  %vm384_vm8 = vweird.f32 %v378_v42  ;;  %564 = vmatpush.msrb.mxu3 %v532_v50 }
  0xdb   :  { %v341_v47 = vsub.f32 1.0, %v340_v46  ;;  %v368_v52 = vmul.f32 %v367_v3, %v1107_v5 }
  0xdc   :  { %v391_v11 = vor.u32 1.1754944e-38, %v390_v2  ;;  %vm389_vm10 = vcmp.eq.f32.partialorder %v388_v6, 8.507059e+37 }
  0xdd   :  { %v342_v53 = vmul.f32 %v718_v43, %v341_v47 }
  0xdf   :  { %v343_v56 = vadd.f32 %v718_v43, %v342_v53 }
  0xe0   :  { %v720_v55 = vpop.eup %719 }
  0xe1   :  { %v380_v59 = vmul.f32 %v720_v55, %v378_v42  ;;  %v347_v62 = vsel %vm346_vm5, %v718_v43, %v343_v56  ;;  %vm385_vm7 = vweird.f32 %v720_v55 }
  0xe2   :  { %v352_v61 = vsel %vm349_vm6, %v351_v58, %v347_v62  ;;  %vm386_vm9 = vmor %vm384_vm8, %vm385_vm7 }
  0xe3   :  { %v381_v63 = vsub.f32 1.0, %v380_v59  ;;  %v353_v0 = vmul.f32 %v352_v61, %v328_v60 }
  0xe5   :  { %v382_v4 = vmul.f32 %v720_v55, %v381_v63  ;;  %v698_v7 = vclamps-f32 %v353_v0, 1.0 }
  0xe7   :  { %v383_v8 = vadd.f32 %v720_v55, %v382_v4  ;;  %v396_v10 = vadd.f32 1.0, %v698_v7 }
  0xe9   :  { %v387_v12 = vsel %vm386_vm9, %v720_v55, %v383_v8  ;;  %v398_v13 = vmul.f32 %v396_v10, %v312_v9  ;;  %v531_v55 = vld [vmem:[#allocation10] sm:$0xff] }
  0xea   :  { %v392_v14 = vsel %vm389_vm10, %v391_v11, %v387_v12  ;;  %565 = vmatpush.msrb.mxu3 %v531_v55 }
  0xeb   :  { %v393_v15 = vmul.f32 %v392_v14, %v368_v52  ;;  %436 = vmatmul.f32.vlgmr.msra.gmra.mxu0 %v398_v13 }
  0xed   :  { %v699_v16 = vclamps-f32 %v393_v15, 1.0 }
  0xef   :  { %v397_v18 = vadd.f32 1.0, %v699_v16 }
  0xf1   :  { %v399_v19 = vmul.f32 %v397_v18, %v313_v17 }
  0xf3   :  { %439 = vmatmul.f32.gmra.mxu0 %v399_v19 }
 0x168   :  { %v437_v20 = vpop.f32.mrf.mxu0 }
 0x169   :  { %v1130_v21 = vadd.f32 %v715_v49, %v437_v20 }
 0x16b   :  { %v1133_v5 = vmul.f32 0.70710677, %v1130_v21 }
 0x16d   :  { %v447_v22 = vmul.f32 %v1133_v5, %v1133_v5 }
 0x16f   :  { %v448_v23 = vmin.f32 %v447_v22, 16.0 }
 0x170   :  { %v440_v24 = vpop.f32.mrf.mxu0 }
 0x171   :  { %v449_v1 = vmul.f32 2.1237322e-06, %v448_v23  ;;  %v460_v26 = vmul.f32 3.8918573e-05, %v448_v23  ;;  %v1137_v27 = vadd.f32 %v715_v49, %v440_v24 }
 0x173   :  { %v450_v29 = vadd.f32 0.00028619796, %v449_v1  ;;  %v461_v30 = vadd.f32 0.001143296, %v460_v26  ;;  %v1140_v31 = vmul.f32 0.70710677, %v1137_v27 }
 0x174   :  { %v444_v44 = vmul.f32 0.5, %v1137_v27 }
 0x175   :  { %v451_v33 = vmul.f32 %v450_v29, %v448_v23  ;;  %v462_v34 = vmul.f32 %v461_v30, %v448_v23  ;;  %v487_v35 = vmul.f32 %v1140_v31, %v1140_v31 }
 0x177   :  { %v463_v37 = vadd.f32 0.014752088, %v462_v34  ;;  %v452_v38 = vadd.f32 0.0036580483, %v451_v33  ;;  %v488_v39 = vmin.f32 %v487_v35, 16.0  ;;  %v443_v35 = vmul.f32 0.5, %v1130_v21 }
 0x179   :  { %v464_v41 = vmul.f32 %v463_v37, %v448_v23  ;;  %v489_v42 = vmul.f32 2.1237322e-06, %v488_v39  ;;  %v500_v43 = vmul.f32 3.8918573e-05, %v488_v39  ;;  %v453_v46 = vmul.f32 %v452_v38, %v448_v23 }
 0x17b   :  { %v465_v45 = vadd.f32 0.112945676, %v464_v41  ;;  %v490_v47 = vadd.f32 0.00028619796, %v489_v42  ;;  %v501_v48 = vadd.f32 0.001143296, %v500_v43 }
 0x17c   :  { %v454_v57 = vadd.f32 0.05243302, %v453_v46  ;;  %v716_v46 = vld [vmem:[%s1191_s11] ss:$0 sm:$0xff] }
 0x17d   :  { %v466_v51 = vmul.f32 %v465_v45, %v448_v23  ;;  %v491_v53 = vmul.f32 %v490_v47, %v488_v39  ;;  %v502_v54 = vmul.f32 %v501_v48, %v488_v39 }
 0x17e   :  { %v455_v63 = vmul.f32 %v454_v57, %v448_v23 }
 0x17f   :  { %v467_v56 = vadd.f32 0.4994258, %v466_v51  ;;  %v503_v58 = vadd.f32 0.014752088, %v502_v54  ;;  %v492_v60 = vadd.f32 0.0036580483, %v491_v53 }
 0x180   :  { %v456_v4 = vadd.f32 0.18741608, %v455_v63 }
 0x181   :  { %v468_v59 = vmul.f32 %v467_v56, %v448_v23  ;;  %v504_v62 = vmul.f32 %v503_v58, %v488_v39  ;;  %v493_v2 = vmul.f32 %v492_v60, %v488_v39 }
 0x182   :  { %v457_v10 = vmul.f32 %v456_v4, %v448_v23 }
 0x183   :  { %v469_v61 = vadd.f32 1.0, %v468_v59  ;;  %v505_v0 = vadd.f32 0.112945676, %v504_v62  ;;  %v494_v7 = vadd.f32 0.05243302, %v493_v2 }
 0x184   :  { %v458_v15 = vadd.f32 1.1283791, %v457_v10 }
 0x185   :  { %721 = vrcp.f32 %v469_v61  ;;  %v506_v3 = vmul.f32 %v505_v0, %v488_v39  ;;  %v495_v12 = vmul.f32 %v494_v7, %v488_v39  ;;  %v481_v14 = vand.u32 2147483648, %v469_v61 }
 0x186   :  { %v479_v17 = vand.u32 2147483647, %v469_v61  ;;  %vm475_vm12 = vweird.f32 %v469_v61  ;;  %v459_v22 = vmul.f32 %v458_v15, %v1133_v5 }
 0x187   :  { %v507_v6 = vadd.f32 0.4994258, %v506_v3  ;;  %v496_v18 = vadd.f32 0.18741608, %v495_v12  ;;  %v482_v49 = vor.u32 1.1754944e-38, %v481_v14 }
 0x188   :  { %vm480_vm14 = vcmp.eq.f32.partialorder %v479_v17, 8.507059e+37 }
 0x189   :  { %v508_v8 = vmul.f32 %v507_v6, %v488_v39  ;;  %v497_v25 = vmul.f32 %v496_v18, %v488_v39 }
 0x18b   :  { %v722_v9 = vpop.eup %721  ;;  %v509_v52 = vadd.f32 1.0, %v508_v8  ;;  %v498_v32 = vadd.f32 1.1283791, %v497_v25 }
 0x18c   :  { %v471_v11 = vmul.f32 %v722_v9, %v469_v61  ;;  %vm476_vm11 = vweird.f32 %v722_v9 }
 0x18d   :  { %723 = vrcp.f32 %v509_v52  ;;  %vm477_vm13 = vmor %vm475_vm12, %vm476_vm11  ;;  %v521_v30 = vand.u32 2147483648, %v509_v52  ;;  %v519_v34 = vand.u32 2147483647, %v509_v52  ;;  %vm515_vm0 = vweird.f32 %v509_v52 }
 0x18e   :  { %v472_v13 = vsub.f32 1.0, %v471_v11  ;;  %v499_v39 = vmul.f32 %v498_v32, %v1140_v31 }
 0x18f   :  { %v522_v38 = vor.u32 1.1754944e-38, %v521_v30  ;;  %vm520_vm3 = vcmp.eq.f32.partialorder %v519_v34, 8.507059e+37 }
 0x190   :  { %v473_v16 = vmul.f32 %v722_v9, %v472_v13 }
 0x192   :  { %v474_v19 = vadd.f32 %v722_v9, %v473_v16 }
 0x193   :  { %v724_v20 = vpop.eup %723 }
 0x194   :  { %v478_v24 = vsel %vm477_vm13, %v722_v9, %v474_v19  ;;  %v511_v1 = vmul.f32 %v724_v20, %v509_v52  ;;  %vm516_vm15 = vweird.f32 %v724_v20 }
 0x195   :  { %v483_v23 = vsel %vm480_vm14, %v482_v49, %v478_v24  ;;  %vm517_vm2 = vmor %vm515_vm0, %vm516_vm15 }
 0x196   :  { %v484_v26 = vmul.f32 %v483_v23, %v459_v22  ;;  %v512_v28 = vsub.f32 1.0, %v511_v1 }
 0x198   :  { %v700_v29 = vclamps-f32 %v484_v26, 1.0  ;;  %v513_v33 = vmul.f32 %v724_v20, %v512_v28 }
 0x19a   :  { %v527_v36 = vadd.f32 1.0, %v700_v29  ;;  %v514_v37 = vadd.f32 %v724_v20, %v513_v33 }
 0x19c   :  { %v529_v5 = vmul.f32 %v527_v36, %v443_v35  ;;  %v518_v40 = vsel %vm517_vm2, %v724_v20, %v514_v37 }
 0x19d   :  { %v523_v41 = vsel %vm520_vm3, %v522_v38, %v518_v40 }
 0x19e   :  { %702 = vmatmul.msk.f32.vlgmr.msrb.gmra.mxu3 %vm543_vm1, %v529_v5  ;;  %v524_v42 = vmul.f32 %v523_v41, %v499_v39 }
 0x1a0   :  { %v701_v43 = vclamps-f32 %v524_v42, 1.0 }
 0x1a2   :  { %v528_v45 = vadd.f32 1.0, %v701_v43 }
 0x1a4   :  { %v530_v21 = vmul.f32 %v528_v45, %v444_v44 }
 0x1a6   :  { %703 = vmatmul.msk.f32.gmra.mxu3 %vm543_vm1, %v530_v21 }
 0x221   :  { %v567_v47 = vpop.f32.mrf.mxu3 }
 0x222   :  { %v1153_v48 = vadd.f32 %v716_v46, %v567_v47 }
 0x224   :  { %v575_v31 = vmul.f32 0.70710677, %v1153_v48 }
 0x226   :  { %v577_v50 = vmul.f32 %v575_v31, %v575_v31 }
 0x228   :  { %v578_v51 = vmin.f32 %v577_v50, 16.0 }
 0x229   :  { %v570_v55 = vpop.f32.mrf.mxu3 }
 0x22a   :  { %v579_v53 = vmul.f32 2.1237322e-06, %v578_v51  ;;  %v590_v54 = vmul.f32 3.8918573e-05, %v578_v51  ;;  %v1156_v56 = vadd.f32 %v716_v46, %v570_v55  ;;  %v573_v55 = vmul.f32 0.5, %v1153_v48 }
 0x22c   :  { %v580_v27 = vadd.f32 0.00028619796, %v579_v53  ;;  %v591_v57 = vadd.f32 0.001143296, %v590_v54  ;;  %v1159_v58 = vmul.f32 0.70710677, %v1156_v56 }
 0x22e   :  { %v581_v59 = vmul.f32 %v580_v27, %v578_v51  ;;  %v592_v60 = vmul.f32 %v591_v57, %v578_v51  ;;  %v617_v62 = vmul.f32 %v1159_v58, %v1159_v58 }
 0x230   :  { %v593_v61 = vadd.f32 0.014752088, %v592_v60  ;;  %v582_v63 = vadd.f32 0.0036580483, %v581_v59  ;;  %v618_v0 = vmin.f32 %v617_v62, 16.0 }
 0x232   :  { %v594_v2 = vmul.f32 %v593_v61, %v578_v51  ;;  %v619_v3 = vmul.f32 2.1237322e-06, %v618_v0  ;;  %v630_v4 = vmul.f32 3.8918573e-05, %v618_v0  ;;  %v583_v7 = vmul.f32 %v582_v63, %v578_v51 }
 0x234   :  { %v595_v6 = vadd.f32 0.112945676, %v594_v2  ;;  %v620_v8 = vadd.f32 0.00028619796, %v619_v3  ;;  %v631_v9 = vadd.f32 0.001143296, %v630_v4 }
 0x235   :  { %v584_v13 = vadd.f32 0.05243302, %v583_v7  ;;  %v574_v3 = vmul.f32 0.5, %v1156_v56 }
 0x236   :  { %v596_v10 = vmul.f32 %v595_v6, %v578_v51  ;;  %v621_v11 = vmul.f32 %v620_v8, %v618_v0  ;;  %v632_v52 = vmul.f32 %v631_v9, %v618_v0  ;;  %v662_v6 = vld [vmem:[%s1180_s0 + $0x8] sm:$0xff] }
 0x237   :  { %v585_v19 = vmul.f32 %v584_v13, %v578_v51 }
 0x238   :  { %v597_v12 = vadd.f32 0.4994258, %v596_v10  ;;  %v633_v14 = vadd.f32 0.014752088, %v632_v52  ;;  %v622_v16 = vadd.f32 0.0036580483, %v621_v11 }
 0x239   :  { %v586_v24 = vadd.f32 0.18741608, %v585_v19 }
 0x23a   :  { %v598_v15 = vmul.f32 %v597_v12, %v578_v51  ;;  %v634_v17 = vmul.f32 %v633_v14, %v618_v0  ;;  %v623_v20 = vmul.f32 %v622_v16, %v618_v0 }
 0x23b   :  { %v587_v28 = vmul.f32 %v586_v24, %v578_v51 }
 0x23c   :  { %v599_v18 = vadd.f32 1.0, %v598_v15  ;;  %v635_v49 = vadd.f32 0.112945676, %v634_v17  ;;  %v624_v25 = vadd.f32 0.05243302, %v623_v20 }
 0x23d   :  { %v588_v35 = vadd.f32 1.1283791, %v587_v28 }
 0x23e   :  { %725 = vrcp.f32 %v599_v18  ;;  %v636_v22 = vmul.f32 %v635_v49, %v618_v0  ;;  %v625_v32 = vmul.f32 %v624_v25, %v618_v0  ;;  %v611_v34 = vand.u32 2147483648, %v599_v18 }
 0x23f   :  { %v609_v37 = vand.u32 2147483647, %v599_v18  ;;  %vm605_vm5 = vweird.f32 %v599_v18  ;;  %v589_v41 = vmul.f32 %v588_v35, %v575_v31  ;;  %v661_v31 = vld [vmem:[%s1180_s0] sm:$0xff] }
 0x240   :  { %v637_v23 = vadd.f32 0.4994258, %v636_v22  ;;  %v626_v5 = vadd.f32 0.18741608, %v625_v32  ;;  %v612_v39 = vor.u32 1.1754944e-38, %v611_v34 }
 0x241   :  { %vm610_vm7 = vcmp.eq.f32.partialorder %v609_v37, 8.507059e+37 }
 0x242   :  { %v638_v1 = vmul.f32 %v637_v23, %v618_v0  ;;  %v627_v44 = vmul.f32 %v626_v5, %v618_v0 }
 0x244   :  { %v726_v26 = vpop.eup %725  ;;  %v639_v30 = vadd.f32 1.0, %v638_v1  ;;  %v628_v51 = vadd.f32 1.1283791, %v627_v44 }
 0x245   :  { %v601_v29 = vmul.f32 %v726_v26, %v599_v18  ;;  %vm606_vm4 = vweird.f32 %v726_v26 }
 0x246   :  { %727 = vrcp.f32 %v639_v30  ;;  %vm607_vm6 = vmor %vm605_vm5, %vm606_vm4  ;;  %v651_v50 = vand.u32 2147483648, %v639_v30  ;;  %v649_v54 = vand.u32 2147483647, %v639_v30  ;;  %vm645_vm9 = vweird.f32 %v639_v30 }
 0x247   :  { %v602_v33 = vsub.f32 1.0, %v601_v29  ;;  %v629_v62 = vmul.f32 %v628_v51, %v1159_v58 }
 0x248   :  { %v652_v60 = vor.u32 1.1754944e-38, %v651_v50  ;;  %vm650_vm11 = vcmp.eq.f32.partialorder %v649_v54, 8.507059e+37 }
 0x249   :  { %v603_v36 = vmul.f32 %v726_v26, %v602_v33 }
 0x24b   :  { %v604_v38 = vadd.f32 %v726_v26, %v603_v36 }
 0x24c   :  { %v728_v40 = vpop.eup %727 }
 0x24d   :  { %v608_v42 = vsel %vm607_vm6, %v726_v26, %v604_v38  ;;  %v641_v45 = vmul.f32 %v728_v40, %v639_v30  ;;  %vm646_vm8 = vweird.f32 %v728_v40 }
 0x24e   :  { %v613_v43 = vsel %vm610_vm7, %v612_v39, %v608_v42  ;;  %vm647_vm10 = vmor %vm645_vm9, %vm646_vm8 }
 0x24f   :  { %v614_v21 = vmul.f32 %v613_v43, %v589_v41  ;;  %v642_v46 = vsub.f32 1.0, %v641_v45 }
 0x251   :  { %v704_v47 = vclamps-f32 %v614_v21, 1.0  ;;  %v643_v53 = vmul.f32 %v728_v40, %v642_v46 }
 0x253   :  { %v657_v27 = vadd.f32 1.0, %v704_v47  ;;  %v644_v57 = vadd.f32 %v728_v40, %v643_v53 }
 0x255   :  { %v659_v59 = vmul.f32 %v657_v27, %v573_v55  ;;  %v648_v61 = vsel %vm647_vm10, %v728_v40, %v644_v57 }
 0x256   :  { %v653_v0 = vsel %vm650_vm11, %v652_v60, %v648_v61 }
 0x257   :  { %v663_v63 = vadd.f32 %v661_v31, %v659_v59  ;;  %v654_v2 = vmul.f32 %v653_v0, %v629_v62 }
 0x259   :  { %665 = vst.msk [vmem:[#allocation11] sm:$0xff] %vm543_vm1, %v663_v63  ;;  %v705_v48 = vclamps-f32 %v654_v2, 1.0 }
 0x25b   :  { %v658_v4 = vadd.f32 1.0, %v705_v48 }
 0x25d   :  { %v660_v58 = vmul.f32 %v658_v4, %v574_v3 }
 0x25f   :  { %v664_v7 = vadd.f32 %v662_v6, %v660_v58 }
 0x261   :  { %666 = vst.msk [vmem:[#allocation11 + $0x8] sm:$0xff] %vm543_vm1, %v664_v7 }
 0x262   :  { %679 = dma.vmem_to_hbm [thread:$0]  %s672_s2, 256, %s674_s24, [#allocation4], %s882_s29, %s882_s29, %s883_s30  }
 0x263   :  { %879 = dma.done.wait [#allocation4], 256  }
 0x264   :  { %880 = vsyncadd [#allocation4], 4294967040 }
 0x265   :  { %684 = vsyncpa [#allocation3], 1 }
 0x266   :  { %685 = vsyncpa [#allocation6], 1 }
 0x267   :  { %686 = vsyncpa [#allocation9], 1 }
 0x268   :  { %687 = vsyncpa [#allocation4], 1 }

</bundles_post_ra>
